<compile_context>
chip_gen: v6e
topology: v6e:2x2x1
jax: 0.10.0
libtpu: 0.0.40
codegen_flags: <defaults>
</compile_context>

<pallas_src>
from functools import partial

import jax
import jax.numpy as jnp
from jax.experimental import pallas as pl
from jax.experimental.pallas import tpu as pltpu


def _make_circconv_kernel(n_adj, group):
    K = 2 * n_adj + 1

    def kernel(x_ref, w_ref, b_ref, o_ref, cols_ref):
        # x_ref:    (1, C_in, L*G)   lane index = l*G + g  (l-major, g-minor)
        # w_ref:    (C_out, K*C_in)  taps flattened k-major / ci-minor
        # b_ref:    (C_out, 1)
        # o_ref:    (1, C_out, L*G)
        # cols_ref: (K*C_in, L*G)    im2col scratch, filled via lane rolls
        C_in = x_ref.shape[1]
        lanes = x_ref.shape[2]          # = L * G
        x = x_ref[0]                    # (C_in, L*G)

        # cols[k*C_in + ci, l*G + g] = x[g, ci, (l + k - n_adj) mod L]
        # Rolling the l-major/g-minor lane axis by (n_adj - k)*G gives exactly
        # the per-batch circular shift (wrap stays inside each batch segment).
        for k in range(K):              # K static & small (2*n_adj + 1)
            shift = ((n_adj - k) * group) % lanes
            tap = x if shift == 0 else pltpu.roll(x, shift=shift, axis=1)
            cols_ref[k * C_in:(k + 1) * C_in, :] = tap

        # One MXU matmul, output lane-dense in L*G; bias as a VPU broadcast add.
        out = jnp.dot(w_ref[...], cols_ref[...],
                      preferred_element_type=jnp.float32)
        o_ref[0] = (out + b_ref[...]).astype(o_ref.dtype)

    return kernel


@partial(jax.jit, static_argnames=("n_adj",))
def circ_conv(x_ncl, weight, bias, *, n_adj):
    """x_ncl: (B, C_in, L); weight: (C_out, C_in, K); bias: (C_out,). -> (B, C_out, L)."""
    B, C_in, L = x_ncl.shape
    C_out, C_in_w, K = weight.shape
    assert C_in_w == C_in and K == 2 * n_adj + 1
    assert 0 <= n_adj <= L

    # Lane-group G batches per grid step so each output slab is >= 128 lanes.
    G = max(1, pl.cdiv(128, L))
    NB = pl.cdiv(B, G)
    B_pad = NB * G
    if B_pad != B:
        x_ncl = jnp.concatenate(
            [x_ncl, jnp.zeros((B_pad - B, C_in, L), x_ncl.dtype)], axis=0)

    # (B_pad, C_in, L) -> (NB, C_in, L*G) with lane index l*G + g (l-major).
    x_grp = (x_ncl.reshape(NB, G, C_in, L)
                  .transpose(0, 2, 3, 1)
                  .reshape(NB, C_in, L * G))

    # Tiny one-time weight prep (CSEd/fused under jit): flatten taps k-major,
    # ci-minor to match the cols row layout; bias as a (C_out, 1) column.
    w_flat = jnp.transpose(weight, (0, 2, 1)).reshape(C_out, K * C_in)
    b_col = bias.reshape(C_out, 1)

    itemsize = x_ncl.dtype.itemsize
    cost = pl.CostEstimate(
        flops=2 * B_pad * C_out * L * K * C_in,
        transcendentals=0,
        bytes_accessed=(B_pad * C_in * L + C_out * K * C_in + C_out
                        + B_pad * C_out * L) * itemsize,
    )

    out_grp = pl.pallas_call(
        _make_circconv_kernel(n_adj, G),
        out_shape=jax.ShapeDtypeStruct((NB, C_out, L * G), x_ncl.dtype),
        grid_spec=pltpu.PrefetchScalarGridSpec(
            num_scalar_prefetch=0,
            grid=(NB,),
            in_specs=[
                pl.BlockSpec((1, C_in, L * G), lambda b: (b, 0, 0)),
                pl.BlockSpec((C_out, K * C_in), lambda b: (0, 0)),
                pl.BlockSpec((C_out, 1), lambda b: (0, 0)),
            ],
            out_specs=pl.BlockSpec((1, C_out, L * G), lambda b: (b, 0, 0)),
            scratch_shapes=[
                pltpu.VMEM((K * C_in, L * G), jnp.float32),
            ],
        ),
        compiler_params=pltpu.CompilerParams(
            dimension_semantics=(("parallel",) if NB > 1 else ("arbitrary",)),
        ),
        cost_estimate=cost,
    )(x_grp, w_flat, b_col)

    # Un-group: (NB, C_out, L*G) -> (B, C_out, L).
    out = (out_grp.reshape(NB, C_out, L, G)
                  .transpose(0, 3, 1, 2)
                  .reshape(B_pad, C_out, L))
    return out[:B]


if __name__ == "__main__":
    # Module config: state_dim=4, out_state_dim=4, n_adj=4 -> kernel_size=9
    B, C_in, C_out, L, n_adj = 2, 4, 4, 16, 4
    K = 2 * n_adj + 1

    key = jax.random.PRNGKey(0)
    kx, kw, kb = jax.random.split(key, 3)
    x = jax.random.normal(kx, (B, C_in, L), dtype=jnp.float32)
    # Deterministic synthetic parameters (shapes match nn.Conv1d(C_in, C_out, K))
    weight = jax.random.normal(kw, (C_out, C_in, K), dtype=jnp.float32) * 0.1
    bias = jax.random.normal(kb, (C_out,), dtype=jnp.float32) * 0.1

    out = circ_conv(x, weight, bias, n_adj=n_adj)
    jax.block_until_ready(out)

    # Cross-check against a pure-JAX reference (circular pad + valid conv).
    x_pad = jnp.concatenate([x[..., -n_adj:], x, x[..., :n_adj]], axis=2)
    ref = jax.lax.conv_general_dilated(
        x_pad, weight, window_strides=(1,), padding="VALID",
        dimension_numbers=("NCH", "OIH", "NCH"),
    ) + bias.reshape(1, C_out, 1)
    assert out.shape == (B, C_out, L)
    assert jnp.allclose(out, ref, atol=1e-5, rtol=1e-5)
    print("KERNEL_OK")
</pallas_src>

<mosaic_0001>
module attributes {stable_mosaic.version = 11 : i64} {
  func.func @kernel(%arg0: i32, %arg1: memref<1x4x128xf32, #tpu.memory_space<vmem>>, %arg2: memref<4x36xf32, #tpu.memory_space<vmem>>, %arg3: memref<4x1xf32, #tpu.memory_space<vmem>>, %arg4: memref<1x4x128xf32, #tpu.memory_space<vmem>>, %arg5: memref<36x128xf32, #tpu.memory_space<vmem>>) attributes {dimension_semantics = [#tpu.dimension_semantics<arbitrary>], iteration_bounds = array<i64: 1>, scalar_prefetch = 0 : i64, scratch_operands = 1 : i64, tpu.core_type = #tpu.core_type<tc>, window_params = [{transform_indices = @transform_0, window_bounds = array<i64: 1, 4, 128>}, {pipeline_mode = #tpu.pipeline_mode<synchronous>, transform_indices = @transform_1, window_bounds = array<i64: 4, 36>}, {pipeline_mode = #tpu.pipeline_mode<synchronous>, transform_indices = @transform_2, window_bounds = array<i64: 4, 1>}, {transform_indices = @transform_3, window_bounds = array<i64: 1, 4, 128>}]} {
    %c0 = arith.constant 0 : index
    %c0_0 = arith.constant 0 : index
    %c0_1 = arith.constant 0 : index
    %0 = vector.load %arg1[%c0, %c0_0, %c0_1] : memref<1x4x128xf32, #tpu.memory_space<vmem>>, vector<1x4x128xf32>
    %1 = vector.shape_cast %0 : vector<1x4x128xf32> to vector<4x128xf32>
    %c32_i32 = arith.constant 32 : i32
    %2 = tpu.dynamic_rotate %1 by %c32_i32 dim 1 : vector<4x128xf32>, i32 -> vector<4x128xf32>
    %c0_2 = arith.constant 0 : index
    %c0_3 = arith.constant 0 : index
    %3 = vector.load %arg5[%c0_2, %c0_3] : memref<36x128xf32, #tpu.memory_space<vmem>>, vector<4x128xf32>
    tpu.vector_store %arg5[%c0_2, %c0_3], %2 {strides = array<i32>} : memref<36x128xf32, #tpu.memory_space<vmem>>, vector<4x128xf32>,
    %c24_i32 = arith.constant 24 : i32
    %4 = tpu.dynamic_rotate %1 by %c24_i32 dim 1 : vector<4x128xf32>, i32 -> vector<4x128xf32>
    %c4 = arith.constant 4 : index
    %c0_4 = arith.constant 0 : index
    %5 = vector.load %arg5[%c4, %c0_4] : memref<36x128xf32, #tpu.memory_space<vmem>>, vector<4x128xf32>
    tpu.vector_store %arg5[%c4, %c0_4], %4 {strides = array<i32>} : memref<36x128xf32, #tpu.memory_space<vmem>>, vector<4x128xf32>,
    %c16_i32 = arith.constant 16 : i32
    %6 = tpu.dynamic_rotate %1 by %c16_i32 dim 1 : vector<4x128xf32>, i32 -> vector<4x128xf32>
    %c8 = arith.constant 8 : index
    %c0_5 = arith.constant 0 : index
    %7 = vector.load %arg5[%c8, %c0_5] : memref<36x128xf32, #tpu.memory_space<vmem>>, vector<4x128xf32>
    tpu.vector_store %arg5[%c8, %c0_5], %6 {strides = array<i32>} : memref<36x128xf32, #tpu.memory_space<vmem>>, vector<4x128xf32>,
    %c8_i32 = arith.constant 8 : i32
    %8 = tpu.dynamic_rotate %1 by %c8_i32 dim 1 : vector<4x128xf32>, i32 -> vector<4x128xf32>
    %c12 = arith.constant 12 : index
    %c0_6 = arith.constant 0 : index
    %9 = vector.load %arg5[%c12, %c0_6] : memref<36x128xf32, #tpu.memory_space<vmem>>, vector<4x128xf32>
    tpu.vector_store %arg5[%c12, %c0_6], %8 {strides = array<i32>} : memref<36x128xf32, #tpu.memory_space<vmem>>, vector<4x128xf32>,
    %c16 = arith.constant 16 : index
    %c0_7 = arith.constant 0 : index
    %10 = vector.load %arg5[%c16, %c0_7] : memref<36x128xf32, #tpu.memory_space<vmem>>, vector<4x128xf32>
    tpu.vector_store %arg5[%c16, %c0_7], %1 {strides = array<i32>} : memref<36x128xf32, #tpu.memory_space<vmem>>, vector<4x128xf32>,
    %c120_i32 = arith.constant 120 : i32
    %11 = tpu.dynamic_rotate %1 by %c120_i32 dim 1 : vector<4x128xf32>, i32 -> vector<4x128xf32>
    %c20 = arith.constant 20 : index
    %c0_8 = arith.constant 0 : index
    %12 = vector.load %arg5[%c20, %c0_8] : memref<36x128xf32, #tpu.memory_space<vmem>>, vector<4x128xf32>
    tpu.vector_store %arg5[%c20, %c0_8], %11 {strides = array<i32>} : memref<36x128xf32, #tpu.memory_space<vmem>>, vector<4x128xf32>,
    %c112_i32 = arith.constant 112 : i32
    %13 = tpu.dynamic_rotate %1 by %c112_i32 dim 1 : vector<4x128xf32>, i32 -> vector<4x128xf32>
    %c24 = arith.constant 24 : index
    %c0_9 = arith.constant 0 : index
    %14 = vector.load %arg5[%c24, %c0_9] : memref<36x128xf32, #tpu.memory_space<vmem>>, vector<4x128xf32>
    tpu.vector_store %arg5[%c24, %c0_9], %13 {strides = array<i32>} : memref<36x128xf32, #tpu.memory_space<vmem>>, vector<4x128xf32>,
    %c104_i32 = arith.constant 104 : i32
    %15 = tpu.dynamic_rotate %1 by %c104_i32 dim 1 : vector<4x128xf32>, i32 -> vector<4x128xf32>
    %c28 = arith.constant 28 : index
    %c0_10 = arith.constant 0 : index
    %16 = vector.load %arg5[%c28, %c0_10] : memref<36x128xf32, #tpu.memory_space<vmem>>, vector<4x128xf32>
    tpu.vector_store %arg5[%c28, %c0_10], %15 {strides = array<i32>} : memref<36x128xf32, #tpu.memory_space<vmem>>, vector<4x128xf32>,
    %c96_i32 = arith.constant 96 : i32
    %17 = tpu.dynamic_rotate %1 by %c96_i32 dim 1 : vector<4x128xf32>, i32 -> vector<4x128xf32>
    %c32 = arith.constant 32 : index
    %c0_11 = arith.constant 0 : index
    %18 = vector.load %arg5[%c32, %c0_11] : memref<36x128xf32, #tpu.memory_space<vmem>>, vector<4x128xf32>
    tpu.vector_store %arg5[%c32, %c0_11], %17 {strides = array<i32>} : memref<36x128xf32, #tpu.memory_space<vmem>>, vector<4x128xf32>,
    %c0_12 = arith.constant 0 : index
    %c0_13 = arith.constant 0 : index
    %19 = vector.load %arg2[%c0_12, %c0_13] : memref<4x36xf32, #tpu.memory_space<vmem>>, vector<4x36xf32>
    %c0_14 = arith.constant 0 : index
    %c0_15 = arith.constant 0 : index
    %20 = vector.load %arg5[%c0_14, %c0_15] : memref<36x128xf32, #tpu.memory_space<vmem>>, vector<36x128xf32>
    %cst = arith.constant dense<0.000000e+00> : vector<4x128xf32>
    %21 = tpu.matmul %19, %20, %cst {dimension_numbers = #tpu.dot_dimension_numbers<[1], [0], [0], [1], [0, 0, 1, 1], [], []>} : vector<4x36xf32>, vector<36x128xf32>, vector<4x128xf32> -> vector<4x128xf32>
    %c0_16 = arith.constant 0 : index
    %c0_17 = arith.constant 0 : index
    %22 = vector.load %arg3[%c0_16, %c0_17] : memref<4x1xf32, #tpu.memory_space<vmem>>, vector<4x1xf32>
    %23 = vector.broadcast %22 : vector<4x1xf32> to vector<4x128xf32>
    %24 = arith.addf %21, %23 : vector<4x128xf32>
    %c0_18 = arith.constant 0 : index
    %c0_19 = arith.constant 0 : index
    %c0_20 = arith.constant 0 : index
    %25 = vector.load %arg4[%c0_18, %c0_19, %c0_20] : memref<1x4x128xf32, #tpu.memory_space<vmem>>, vector<1x4x128xf32>
    %26 = vector.shape_cast %25 : vector<1x4x128xf32> to vector<4x128xf32>
    %27 = vector.shape_cast %24 : vector<4x128xf32> to vector<1x4x128xf32>
    tpu.vector_store %arg4[%c0_18, %c0_19, %c0_20], %27 {strides = array<i32>} : memref<1x4x128xf32, #tpu.memory_space<vmem>>, vector<1x4x128xf32>,
    return
  }
  func.func @transform_0(%arg0: i32) -> (i32, i32, i32) {
    %c0_i32 = arith.constant 0 : i32
    %c0_i32_0 = arith.constant 0 : i32
    %c0_i32_1 = arith.constant 0 : i32
    return %arg0, %c0_i32, %c0_i32_0 : i32, i32, i32
  }
  func.func @transform_1(%arg0: i32) -> (i32, i32) {
    %c0_i32 = arith.constant 0 : i32
    %c0_i32_0 = arith.constant 0 : i32
    %c0_i32_1 = arith.constant 0 : i32
    return %c0_i32, %c0_i32_0 : i32, i32
  }
  func.func @transform_2(%arg0: i32) -> (i32, i32) {
    %c0_i32 = arith.constant 0 : i32
    %c0_i32_0 = arith.constant 0 : i32
    %c0_i32_1 = arith.constant 0 : i32
    return %c0_i32, %c0_i32_0 : i32, i32
  }
  func.func @transform_3(%arg0: i32) -> (i32, i32, i32) {
    %c0_i32 = arith.constant 0 : i32
    %c0_i32_0 = arith.constant 0 : i32
    %c0_i32_1 = arith.constant 0 : i32
    return %arg0, %c0_i32, %c0_i32_0 : i32, i32, i32
  }
}

</mosaic_0001>

<bundles_post_ra>
// kernel: circ_conv.1
= control target key start
LH: loop header
LB: loop body
LE: loop exit
PB: predicated region body
PF: predicated region fallthrough
CT: control target
= control target key end

     0   :  { %v168_v1 = vmov 0.0   ;;  %s169_s14 = smov 104   ;;  %s170_s15 = smov 96   ;;  %vm173_vm0 = vmmov 0   ;;  %v176_v2 = vmov 0   ;;  %vm56_vm1 = vcmask 1043456   ;;  %s211_s0 = inlined_call_operand.vmem [shape: f32[1,4,128], index: 0, kind: input, shape index: {}]   ;;  %s212_s2 = inlined_call_operand.vmem [shape: f32[4,1], index: 2, kind: input, shape index: {}]   ;;  %s213_s1 = inlined_call_operand.vmem [shape: f32[4,36], index: 1, kind: input, shape index: {}]   ;;  %s214_s3 = inlined_call_operand.vmem [shape: f32[1,4,128], index: 3, kind: output, shape index: {}]  }
   0x1   :  { %v14_v0 = vld [vmem:[%s211_s0] sm:$0xf]  ;;  %143 = vmatprep.subr.mxu0 %v168_v1  ;;  %s171_s16 = smov 120   ;;  %s172_s17 = smov 112   ;;  %153 = vmatprep.mubr.msk.f32.mxu0 %vm173_vm0, %v168_v1  ;;  %vm52_vm2 = vcmask 293888  }
   0x2   :  { %34 = vrot.lane.b32.xlu1 %v14_v0, %s169_s14  ;;  %27 = vst [vmem:[#allocation2 + $0x10] sm:$0xf] %v14_v0  ;;  %37 = vrot.lane.b32.xlu0 %v14_v0, %s170_s15  ;;  %s174_s18 = smov 8   ;;  %s175_s19 = smov 16   ;;  %v46_v3 = vld [vmem:[%s212_s2] sm:$0xf] }
   0x3   :  { %167 = vset.pattern.permute.xlu0 %v176_v2  ;;  %s177_s0 = smov 24   ;;  %s178_s20 = smov 32   ;;  %v40_v16 = vld [vmem:[%s213_s1] sm:$0xf] }
   0x6   :  { %28 = vrot.lane.b32.xlu1 %v14_v0, %s171_s16  ;;  %31 = vrot.lane.b32.xlu0 %v14_v0, %s172_s17 }
   0xa   :  { %24 = vrot.lane.b32.xlu1 %v14_v0, %s174_s18  ;;  %21 = vrot.lane.b32.xlu0 %v14_v0, %s175_s19 }
   0xe   :  { %18 = vrot.lane.b32.xlu1 %v14_v0, %s177_s0  ;;  %15 = vrot.lane.b32.xlu0 %v14_v0, %s178_s20 }
  0x12   :  { %49 = vperm.xlu0 %167, %v46_v3  }
  0x74   :  { %v35_v4 = vpop.permute.xlu1 %34  ;;  %v38_v5 = vpop.permute.xlu0 %37 }
  0x75   :  { %36 = vst [vmem:[#allocation2 + $0x1c] sm:$0xf] %v35_v4  ;;  %39 = vst [vmem:[#allocation2 + $0x20] sm:$0xf] %v38_v5 }
  0x78   :  { %v29_v6 = vpop.permute.xlu1 %28  ;;  %v32_v7 = vpop.permute.xlu0 %31 }
  0x79   :  { %30 = vst [vmem:[#allocation2 + $0x14] sm:$0xf] %v29_v6  ;;  %33 = vst [vmem:[#allocation2 + $0x18] sm:$0xf] %v32_v7 }
  0x7c   :  { %v25_v8 = vpop.permute.xlu1 %24  ;;  %v22_v9 = vpop.permute.xlu0 %21  ;;  %v45_v10 = vld [vmem:[#allocation2 + $0x20] sm:$0xf] }
  0x7d   :  { %26 = vst [vmem:[#allocation2 + $0xc] sm:$0xf] %v25_v8  ;;  %23 = vst [vmem:[#allocation2 + $0x8] sm:$0xf] %v22_v9  ;;  %144 = vmatpush3.msk.msra.mxu0 %vm56_vm1, %v45_v10 }
  0x7e   :  { %145 = vmatprep.subr.mxu0 %v168_v1 }
  0x80   :  { %v19_v11 = vpop.permute.xlu1 %18  ;;  %v16_v12 = vpop.permute.xlu0 %15  ;;  %v44_v13 = vld [vmem:[#allocation2 + $0x18] sm:$0xff]  ;;  %v43_v14 = vld [vmem:[#allocation2 + $0x10] sm:$0xff] }
  0x81   :  { %20 = vst [vmem:[#allocation2 + $0x4] sm:$0xf] %v19_v11  ;;  %17 = vst [vmem:[#allocation2] sm:$0xf] %v16_v12  ;;  %146 = vmatpush3.msra.mxu0 %v44_v13 }
  0x82   :  { %147 = vmatprep.subr.mxu0 %v168_v1 }
  0x83   :  { %148 = vmatpush3.msra.mxu0 %v43_v14 }
  0x84   :  { %149 = vmatprep.subr.mxu0 %v168_v1  ;;  %v42_v15 = vld [vmem:[#allocation2 + $0x8] sm:$0xff] }
  0x85   :  { %150 = vmatpush3.msra.mxu0 %v42_v15 }
  0x86   :  { %151 = vmatprep.subr.mxu0 %v168_v1 }
  0x88   :  { %v41_v17 = vld [vmem:[#allocation2] sm:$0xff] }
  0x89   :  { %152 = vmatpush3.msra.mxu0 %v41_v17 }
  0x8a   :  { %154 = vmatmul.mubr.msk.f32.vlgmr.msra.gmra.mxu0 %vm52_vm2, %v40_v16 }
  0x8d   :  { %v50_v18 = vpop.permute.xlu0 %49 }
 0x14a   :  { %v126_v19 = vpop.f32.mrf.mxu0 }
 0x14b   :  { %v127_v20 = vadd.f32 %v126_v19, %v50_v18 }
 0x14c   :  { %v155_v21 = vpop.f32.mrf.mxu0 }
 0x14d   :  { %130 = vst [vmem:[%s214_s3] sm:$0xf] %v127_v20 }

</bundles_post_ra>
